<compile_context>
chip_gen: v5e
topology: v5e:2x2
jax: 0.10.0
libtpu: 0.0.40
codegen_flags: <defaults>
</compile_context>

<pallas_src>
import functools
import math

import numpy as np
import jax
import jax.numpy as jnp
from jax.experimental import pallas as pl
from jax.experimental.pallas import tpu as pltpu

IGNORE_ID = -1


@functools.lru_cache(maxsize=None)
def _vmem_limit():
    """Half of the per-core physical VMEM, capped at 64 MiB (safe on v5e/v6e/v7x)."""
    cap = 64 * 1024 * 1024
    try:
        cap = int(pltpu.get_tpu_info().vmem_capacity_bytes)
    except Exception:
        pass
    return int(min(cap // 2, 64 * 1024 * 1024))


@functools.lru_cache(maxsize=None)
def _attn_tile_cap():
    """256-wide attention tiles on v6e/v7x (2x256x256 MXU), 128 on v5e and fallback."""
    try:
        kind = jax.devices()[0].device_kind.lower()
    except Exception:
        return 128
    return 256 if ("v6" in kind or "v7" in kind) else 128


def _tile(dim, cap):
    """Largest power-of-two-ish tile <= cap that divides dim (else the full dim)."""
    for t in (cap, 512, 256, 128, 64, 32, 16, 8):
        if t <= cap and dim % t == 0:
            return t
    return dim


# ---------------------- fused speaker-embedding normalize + affine ----------------------

def _spk_norm_affine_kernel(x_ref, w_ref, b_ref, o_ref):
    x = x_ref[...]                                                     # (B, spk) f32
    inv = jax.lax.rsqrt(jnp.maximum(jnp.sum(x * x, axis=1, keepdims=True), 1e-24))
    xn = (x * inv).astype(jnp.bfloat16)
    y = jnp.dot(xn, w_ref[...], preferred_element_type=jnp.float32) + b_ref[...]
    o_ref[...] = y.astype(o_ref.dtype)


def pallas_spk_norm_affine(x, w_bf16, b):
    B, _ = x.shape
    D = w_bf16.shape[1]
    return pl.pallas_call(
        _spk_norm_affine_kernel,
        out_shape=jax.ShapeDtypeStruct((B, D), jnp.bfloat16),
    )(x.astype(jnp.float32), w_bf16, b.reshape(1, D).astype(jnp.float32))


# ---------------------- fused stand-in text encoder (tanh MLP + folded affine) ----------------------

def _encoder_kernel(x_ref, w1_ref, b1_ref, w2_ref, b2_ref, o_ref):
    h = jnp.dot(x_ref[...], w1_ref[...], preferred_element_type=jnp.float32) + b1_ref[...]
    h = jnp.tanh(h)                                                    # f32 activation math
    y = jnp.dot(h.astype(jnp.bfloat16), w2_ref[...],
                preferred_element_type=jnp.float32) + b2_ref[...]
    o_ref[...] = y.astype(o_ref.dtype)


def pallas_text_encoder(x2d, w1, b1, w2, b2):
    M, K = x2d.shape
    H = w1.shape[1]
    D = w2.shape[1]
    tm = _tile(M, 512)
    return pl.pallas_call(
        _encoder_kernel,
        grid=(M // tm,),
        in_specs=[
            pl.BlockSpec((tm, K), lambda i: (i, 0)),
            pl.BlockSpec((K, H), lambda i: (0, 0)),
            pl.BlockSpec((1, H), lambda i: (0, 0)),
            pl.BlockSpec((H, D), lambda i: (0, 0)),
            pl.BlockSpec((1, D), lambda i: (0, 0)),
        ],
        out_specs=pl.BlockSpec((tm, D), lambda i: (i, 0)),
        out_shape=jax.ShapeDtypeStruct((M, D), jnp.bfloat16),
        compiler_params=pltpu.CompilerParams(
            dimension_semantics=("parallel",),
            vmem_limit_bytes=_vmem_limit(),
        ),
    )(x2d, w1, b1.reshape(1, H).astype(jnp.float32),
      w2, b2.reshape(1, D).astype(jnp.float32))


# ---------------------------- fused QKV projection (3 lane-dense outputs) ----------------------------

def _qkv_kernel(x_ref, w_ref, b_ref, q_ref, k_ref, v_ref):
    y = jnp.dot(x_ref[...], w_ref[...], preferred_element_type=jnp.float32) + b_ref[...]
    D = q_ref.shape[-1]
    q_ref[...] = y[:, :D].astype(q_ref.dtype)          # 128-aligned lane slices (in-register)
    k_ref[...] = y[:, D:2 * D].astype(k_ref.dtype)
    v_ref[...] = y[:, 2 * D:].astype(v_ref.dtype)


def pallas_qkv(x2d, w, b):
    M, D = x2d.shape
    N = w.shape[1]                                     # 3*D: single 384-wide MXU pass
    tm = _tile(M, 512)
    out_sds = jax.ShapeDtypeStruct((M, D), jnp.bfloat16)
    return pl.pallas_call(
        _qkv_kernel,
        grid=(M // tm,),
        in_specs=[
            pl.BlockSpec((tm, D), lambda i: (i, 0)),
            pl.BlockSpec((D, N), lambda i: (0, 0)),
            pl.BlockSpec((1, N), lambda i: (0, 0)),
        ],
        out_specs=(pl.BlockSpec((tm, D), lambda i: (i, 0)),
                   pl.BlockSpec((tm, D), lambda i: (i, 0)),
                   pl.BlockSpec((tm, D), lambda i: (i, 0))),
        out_shape=(out_sds, out_sds, out_sds),
        compiler_params=pltpu.CompilerParams(
            dimension_semantics=("parallel",),
            vmem_limit_bytes=_vmem_limit(),
        ),
    )(x2d, w, b.reshape(1, N).astype(jnp.float32))


# ------------------- flash attention: q-tiled, causal kv-block skip, mask built in-kernel -------------------

def _flash_attn_kernel(len_ref, q_ref, k_ref, v_ref, o_ref, m_ref, l_ref, acc_ref,
                       *, scale, tq, tkv):
    b = pl.program_id(0)
    qi = pl.program_id(1)
    kvi = pl.program_id(2)

    @pl.when(kvi == 0)
    def _():
        m_ref[...] = jnp.full_like(m_ref, -1e30)
        l_ref[...] = jnp.zeros_like(l_ref)
        acc_ref[...] = jnp.zeros_like(acc_ref)

    q_start = qi * tq
    kv_start = kvi * tkv
    seq_len = len_ref[b]

    # Skip kv blocks that are entirely above the causal diagonal or past the sequence end.
    @pl.when((kv_start <= q_start + tq - 1) & (kv_start < seq_len))
    def _():
        q = q_ref[0]                                   # (tq, D) bf16
        k = k_ref[0]                                   # (tkv, D) bf16
        v = v_ref[0]
        s = jax.lax.dot_general(q, k, (((1,), (1,)), ((), ())),
                                preferred_element_type=jnp.float32) * scale
        q_idx = jax.lax.broadcasted_iota(jnp.int32, (tq, tkv), 0) + q_start
        kv_idx = jax.lax.broadcasted_iota(jnp.int32, (tq, tkv), 1) + kv_start
        valid = (kv_idx <= q_idx) & (kv_idx < seq_len)             # causal + key padding
        s = jnp.where(valid, s, -1e30)

        # m/l scratch are lane-dense (tq, 128): all lanes hold the same value, so a
        # max-reduce recovers the (tq, 1) running statistic without masked loads/stores.
        m_prev = jnp.max(m_ref[...], axis=-1, keepdims=True)
        l_prev = jnp.max(l_ref[...], axis=-1, keepdims=True)
        m_new = jnp.maximum(m_prev, jnp.max(s, axis=-1, keepdims=True))
        alpha = jnp.exp(m_prev - m_new)
        p = jnp.exp(s - m_new)
        l_new = alpha * l_prev + jnp.sum(p, axis=-1, keepdims=True)
        acc_ref[...] = alpha * acc_ref[...] + jax.lax.dot_general(
            p.astype(jnp.bfloat16), v, (((1,), (0,)), ((), ())),
            preferred_element_type=jnp.float32)
        m_ref[...] = jnp.broadcast_to(m_new, m_ref.shape)
        l_ref[...] = jnp.broadcast_to(l_new, l_ref.shape)

    @pl.when(kvi == pl.num_programs(2) - 1)
    def _():
        l = jnp.max(l_ref[...], axis=-1, keepdims=True)
        o_ref[0] = (acc_ref[...] / l).astype(o_ref.dtype)          # exact divide (parity)


def pallas_flash_attention(q, k, v, seq_len):
    B, T, D = q.shape
    cap = _attn_tile_cap()
    tq = _tile(T, cap)
    tkv = _tile(T, cap)
    kern = functools.partial(_flash_attn_kernel, scale=1.0 / float(D) ** 0.5, tq=tq, tkv=tkv)
    grid_spec = pltpu.PrefetchScalarGridSpec(
        num_scalar_prefetch=1,
        grid=(B, T // tq, T // tkv),
        in_specs=[
            pl.BlockSpec((1, tq, D), lambda b, qi, kv, lens: (b, qi, 0)),
            pl.BlockSpec((1, tkv, D), lambda b, qi, kv, lens: (b, kv, 0)),
            pl.BlockSpec((1, tkv, D), lambda b, qi, kv, lens: (b, kv, 0)),
        ],
        out_specs=pl.BlockSpec((1, tq, D), lambda b, qi, kv, lens: (b, qi, 0)),
        scratch_shapes=[
            pltpu.VMEM((tq, 128), jnp.float32),        # running max (lane-dense)
            pltpu.VMEM((tq, 128), jnp.float32),        # running sum (lane-dense)
            pltpu.VMEM((tq, D), jnp.float32),          # accumulator
        ],
    )
    return pl.pallas_call(
        kern,
        grid_spec=grid_spec,
        out_shape=jax.ShapeDtypeStruct((B, T, D), jnp.bfloat16),
        compiler_params=pltpu.CompilerParams(
            dimension_semantics=("parallel", "parallel", "arbitrary"),
            vmem_limit_bytes=_vmem_limit(),
        ),
    )(seq_len.astype(jnp.int32),
      q.astype(jnp.bfloat16), k.astype(jnp.bfloat16), v.astype(jnp.bfloat16))


# --------------- fused attention-output proj + residual + FFN(relu) + residual ---------------

def _attn_out_ffn_kernel(a_ref, x_ref, wo_ref, bo_ref, w1_ref, b1_ref, w2_ref, b2_ref, o_ref):
    h = jnp.dot(a_ref[...], wo_ref[...], preferred_element_type=jnp.float32) + bo_ref[...]
    h = h + x_ref[...].astype(jnp.float32)                             # residual 1
    ff = jnp.dot(h.astype(jnp.bfloat16), w1_ref[...],
                 preferred_element_type=jnp.float32) + b1_ref[...]
    ff = jnp.maximum(ff, 0.0)                                          # relu in f32
    y = jnp.dot(ff.astype(jnp.bfloat16), w2_ref[...],
                preferred_element_type=jnp.float32) + b2_ref[...]
    o_ref[...] = (y + h).astype(o_ref.dtype)                           # residual 2


def pallas_attn_block(attn2d, x2d, wo, bo, w1, b1, w2, b2):
    M, D = attn2d.shape
    F = w1.shape[1]
    tm = _tile(M, 512)
    return pl.pallas_call(
        _attn_out_ffn_kernel,
        grid=(M // tm,),
        in_specs=[
            pl.BlockSpec((tm, D), lambda i: (i, 0)),
            pl.BlockSpec((tm, D), lambda i: (i, 0)),
            pl.BlockSpec((D, D), lambda i: (0, 0)),
            pl.BlockSpec((1, D), lambda i: (0, 0)),
            pl.BlockSpec((D, F), lambda i: (0, 0)),
            pl.BlockSpec((1, F), lambda i: (0, 0)),
            pl.BlockSpec((F, D), lambda i: (0, 0)),
            pl.BlockSpec((1, D), lambda i: (0, 0)),
        ],
        out_specs=pl.BlockSpec((tm, D), lambda i: (i, 0)),
        out_shape=jax.ShapeDtypeStruct((M, D), jnp.bfloat16),
        compiler_params=pltpu.CompilerParams(
            dimension_semantics=("parallel",),
            vmem_limit_bytes=_vmem_limit(),
        ),
    )(attn2d, x2d, wo, bo.reshape(1, D).astype(jnp.float32),
      w1, b1.reshape(1, F).astype(jnp.float32),
      w2, b2.reshape(1, D).astype(jnp.float32))


# -------- fused llm_decoder matmul + label-smoothing loss + accuracy (logits never hit HBM) --------

def _decoder_loss_kernel(x_ref, w_ref, b_ref, tgt_ref, out_ref,
                         m_sc, l_sc, s_sc, t_sc, bm_sc, bi_sc,
                         *, confidence, eps, plogp, vocab):
    i = pl.program_id(0)
    j = pl.program_id(1)
    nv = pl.num_programs(1)
    tm = x_ref.shape[0]
    tv = w_ref.shape[1]

    @pl.when((i == 0) & (j == 0))
    def _():
        out_ref[...] = jnp.zeros_like(out_ref)

    @pl.when(j == 0)
    def _():
        m_sc[...] = jnp.full_like(m_sc, -1e30)
        l_sc[...] = jnp.zeros_like(l_sc)
        s_sc[...] = jnp.zeros_like(s_sc)
        t_sc[...] = jnp.zeros_like(t_sc)
        bm_sc[...] = jnp.full_like(bm_sc, -1e30)
        bi_sc[...] = jnp.full_like(bi_sc, vocab)

    tgt = tgt_ref[...]                                                 # (tm, 1) int32
    logits = jnp.dot(x_ref[...], w_ref[...],
                     preferred_element_type=jnp.float32) + b_ref[...]  # (tm, tv) f32
    vidx = jax.lax.broadcasted_iota(jnp.int32, (tm, tv), 1) + j * tv

    blk_max = jnp.max(logits, axis=-1, keepdims=True)
    blk_arg = jnp.min(jnp.where(logits >= blk_max, vidx, vocab), axis=-1, keepdims=True)

    # Scratch is lane-dense broadcast; a max-reduce recovers the per-row scalar.
    m_prev = jnp.max(m_sc[...], axis=-1, keepdims=True)
    l_prev = jnp.max(l_sc[...], axis=-1, keepdims=True)
    s_prev = jnp.max(s_sc[...], axis=-1, keepdims=True)
    t_prev = jnp.max(t_sc[...], axis=-1, keepdims=True)
    bm_prev = jnp.max(bm_sc[...], axis=-1, keepdims=True)
    bi_prev = jnp.max(bi_sc[...], axis=-1, keepdims=True)

    m_new = jnp.maximum(m_prev, blk_max)
    l_new = l_prev * jnp.exp(m_prev - m_new) + jnp.sum(jnp.exp(logits - m_new),
                                                       axis=-1, keepdims=True)
    s_new = s_prev + jnp.sum(logits, axis=-1, keepdims=True)
    t_new = t_prev + jnp.sum(jnp.where(vidx == tgt, logits, 0.0), axis=-1, keepdims=True)

    better = blk_max > bm_prev
    equal = blk_max == bm_prev
    bi_new = jnp.where(better, blk_arg,
                       jnp.where(equal, jnp.minimum(bi_prev, blk_arg), bi_prev))
    bm_new = jnp.maximum(bm_prev, blk_max)

    m_sc[...] = jnp.broadcast_to(m_new, m_sc.shape)
    l_sc[...] = jnp.broadcast_to(l_new, l_sc.shape)
    s_sc[...] = jnp.broadcast_to(s_new, s_sc.shape)
    t_sc[...] = jnp.broadcast_to(t_new, t_sc.shape)
    bm_sc[...] = jnp.broadcast_to(bm_new, bm_sc.shape)
    bi_sc[...] = jnp.broadcast_to(bi_new, bi_sc.shape)

    @pl.when(j == nv - 1)
    def _():
        lse = m_new + jnp.log(l_new)                                   # (tm, 1)
        valid = tgt != IGNORE_ID
        logq_t = t_new - lse
        sum_logq = s_new - vocab * lse                                 # sum_v logq_v, no (tm,V) temp
        # KL(true_dist || softmax) with Sum[p log p] folded into a static constant.
        row_loss = plogp - ((confidence - eps) * logq_t + eps * sum_logq)
        row_loss = jnp.where(valid, row_loss, 0.0)
        correct = jnp.where(valid & (bi_new == tgt), 1.0, 0.0)
        validf = valid.astype(jnp.float32)

        loss_sum = jnp.sum(row_loss, axis=0, keepdims=True)            # (1, 1)
        n_valid = jnp.sum(validf, axis=0, keepdims=True)
        n_correct = jnp.sum(correct, axis=0, keepdims=True)

        lane = jax.lax.broadcasted_iota(jnp.int32, out_ref.shape, 1)
        out_ref[...] += (jnp.where(lane == 0, loss_sum, 0.0)
                         + jnp.where(lane == 1, n_valid, 0.0)
                         + jnp.where(lane == 2, n_correct, 0.0))


def pallas_decoder_loss(x2d, dec_w, dec_b, targets, *, smoothing):
    M, D = x2d.shape
    V = dec_w.shape[1]
    tm = _tile(M, 256)
    tv = _tile(V, 512)
    confidence = 1.0 - smoothing
    eps = smoothing / (V - 1) if V > 1 else 0.0

    def xlogx(v):
        return float(v * math.log(v)) if v > 0 else 0.0

    plogp = xlogx(confidence) + (V - 1) * xlogx(eps)
    kern = functools.partial(_decoder_loss_kernel, confidence=confidence, eps=eps,
                             plogp=plogp, vocab=V)
    out = pl.pallas_call(
        kern,
        grid=(M // tm, V // tv),
        in_specs=[
            pl.BlockSpec((tm, D), lambda i, j: (i, 0)),
            pl.BlockSpec((D, tv), lambda i, j: (0, j)),
            pl.BlockSpec((1, tv), lambda i, j: (0, j)),
            pl.BlockSpec((tm, 1), lambda i, j: (i, 0)),
        ],
        out_specs=pl.BlockSpec((1, 128), lambda i, j: (0, 0)),
        out_shape=jax.ShapeDtypeStruct((1, 128), jnp.float32),
        scratch_shapes=[
            pltpu.VMEM((tm, 128), jnp.float32),        # running max
            pltpu.VMEM((tm, 128), jnp.float32),        # running sumexp
            pltpu.VMEM((tm, 128), jnp.float32),        # running sum(logits)
            pltpu.VMEM((tm, 128), jnp.float32),        # target logit
            pltpu.VMEM((tm, 128), jnp.float32),        # best value
            pltpu.VMEM((tm, 128), jnp.int32),          # best index (first-occurrence tie-break)
        ],
        compiler_params=pltpu.CompilerParams(
            dimension_semantics=("arbitrary", "arbitrary"),
            vmem_limit_bytes=_vmem_limit(),
        ),
    )(x2d, dec_w, dec_b.reshape(1, V).astype(jnp.float32),
      targets.reshape(M, 1).astype(jnp.int32))
    return out[0, 0], out[0, 1], out[0, 2]


# --------------------------- parameter construction ------------------------

def init_params(key, cfg):
    D = cfg["llm_input_size"]
    te_in = cfg["text_encoder_input_size"]
    V = cfg["speech_token_size"] + 3
    ffn = cfg["ffn_size"]
    spk = cfg["spk_embed_dim"]
    d_tok, d_tone = cfg["text_token_dim"], cfg["text_tone_dim"]
    d_lang, d_prsd = cfg["text_lang_dim"], cfg["text_prsd_dim"]
    assert d_tok + d_tone + d_lang + d_prsd == te_in

    names_shapes = [
        ("pho_token_emb", (cfg["text_token_size"], d_tok)),
        ("pho_tone_emb", (cfg["text_tone_size"], d_tone)),
        ("pho_lang_emb", (cfg["text_lang_size"], d_lang)),
        ("pho_prsd_emb", (cfg["text_prsd_size"], d_prsd)),
        ("llm_text_emb", (cfg["llm_text_vocab"], D)),
        ("enc_w1", (te_in, te_in)), ("enc_b1", (te_in,)),
        ("enc_w2", (te_in, te_in)), ("enc_b2", (te_in,)),
        ("affine_w", (te_in, D)), ("affine_b", (D,)),
        ("llm_embedding", (2, D)),
        ("speech_embedding", (V, D)),
        ("spk_affine_w", (spk, D)), ("spk_affine_b", (D,)),
        ("wqkv", (D, 3 * D)), ("bqkv", (3 * D,)),
        ("wo", (D, D)), ("bo", (D,)),
        ("ffn_w1", (D, ffn)), ("ffn_b1", (ffn,)),
        ("ffn_w2", (ffn, D)), ("ffn_b2", (D,)),
        ("dec_w", (D, V)), ("dec_b", (V,)),
    ]
    keys = jax.random.split(key, len(names_shapes))
    raw = {name: 0.05 * jax.random.normal(k, shape, jnp.float32)
           for (name, shape), k in zip(names_shapes, keys)}

    bf = jnp.bfloat16
    # Weights / embedding tables cast to bf16 ONCE here (no per-call converts);
    # biases stay f32 for the f32 kernel epilogues.
    params = {
        "pho_token_emb": raw["pho_token_emb"].astype(bf),
        "pho_tone_emb": raw["pho_tone_emb"].astype(bf),
        "pho_lang_emb": raw["pho_lang_emb"].astype(bf),
        "pho_prsd_emb": raw["pho_prsd_emb"].astype(bf),
        "llm_text_emb": raw["llm_text_emb"].astype(bf),
        "llm_embedding": raw["llm_embedding"].astype(bf),
        "speech_embedding": raw["speech_embedding"].astype(bf),
        "enc_w1": raw["enc_w1"].astype(bf), "enc_b1": raw["enc_b1"],
        # Fold stand-in encoder layer-2 with text_encoder_affine_layer (one fewer pass).
        "enc_w2a": (raw["enc_w2"] @ raw["affine_w"]).astype(bf),
        "enc_b2a": raw["enc_b2"] @ raw["affine_w"] + raw["affine_b"],
        "spk_affine_w": raw["spk_affine_w"].astype(bf), "spk_affine_b": raw["spk_affine_b"],
        "wqkv": raw["wqkv"].astype(bf), "bqkv": raw["bqkv"],
        "wo": raw["wo"].astype(bf), "bo": raw["bo"],
        "ffn_w1": raw["ffn_w1"].astype(bf), "ffn_b1": raw["ffn_b1"],
        "ffn_w2": raw["ffn_w2"].astype(bf), "ffn_b2": raw["ffn_b2"],
        "dec_w": raw["dec_w"].astype(bf), "dec_b": raw["dec_b"],
    }
    return params


# ------------------------------ forward pass --------------------------------

def qwen2lm_phoneme_forward(params, batch, cfg):
    text_token = batch["text_token"]                # (B, Lt) int32
    txt_len = [int(x) for x in batch["text_token_len"]]
    pho_token = batch["pho_token"]                  # (B, Lp, 4) int32
    pho_len = [int(x) for x in batch["pho_token_len"]]
    speech_token = batch["speech_token"]            # (B, Ls) int32
    sp_len = [int(x) for x in batch["speech_token_len"]]
    embedding = batch["embedding"]                  # (B, spk_embed_dim) f32

    B, Lt = text_token.shape
    Lp = pho_token.shape[1]
    D = cfg["llm_input_size"]
    te_in = cfg["text_encoder_input_size"]

    seq_lens = [3 + txt_len[i] + pho_len[i] + sp_len[i] for i in range(B)]
    T = ((max(seq_lens) + 127) // 128) * 128        # lane-aligned sequence bucket

    # ---- lm_target (host-side static-length packing; matches pad_sequence(IGNORE_ID)) ----
    st_np = np.asarray(speech_token)
    tgt_np = np.full((B, T), IGNORE_ID, dtype=np.int32)
    for i in range(B):
        row = ([IGNORE_ID] * (2 + txt_len[i] + pho_len[i])
               + list(st_np[i, : sp_len[i]]) + [cfg["speech_token_size"]])
        tgt_np[i, : len(row)] = row
    lm_target = jnp.asarray(tgt_np)

    # ---- phoneme embeddings (token/tone/lang/prsd), bf16 gathers, prosody zeroed if unused ----
    pho_tok = params["pho_token_emb"][pho_token[:, :, 0]]
    pho_tone = params["pho_tone_emb"][pho_token[:, :, 1]]
    pho_lang = params["pho_lang_emb"][pho_token[:, :, 2]]
    pho_prsd = params["pho_prsd_emb"][pho_token[:, :, 3]]
    if not cfg["use_frontend_prsd"]:
        pho_prsd = pho_prsd * 0
    pho_emb = jnp.concatenate([pho_tok, pho_tone, pho_lang, pho_prsd], axis=-1)

    # ---- stand-in text_encoder (tanh MLP) with the affine layer folded in (one kernel) ----
    # TODO(synk): the real text_encoder / Qwen2 llm are externally injected modules.
    pho_enc = pallas_text_encoder(
        pho_emb.reshape(B * Lp, te_in),
        params["enc_w1"], params["enc_b1"],
        params["enc_w2a"], params["enc_b2a"]).reshape(B, Lp, D)      # bf16

    # ---- text token embedding (stand-in for llm.model.model.embed_tokens) ----
    # TODO(synk): training-time random text-embedding masking / Dropout(0.2) omitted (eval path).
    text_emb = params["llm_text_emb"][text_token]                    # (B, Lt, D) bf16

    # ---- speaker embedding: F.normalize(dim=1) + affine, fused in one kernel ----
    spk = pallas_spk_norm_affine(embedding, params["spk_affine_w"], params["spk_affine_b"])

    sos_eos_emb = params["llm_embedding"][0]
    task_id_emb = params["llm_embedding"][1]
    speech_emb = params["speech_embedding"][speech_token]            # (B, Ls, D) bf16

    # ---- pad_unpad_sequence as one vectorized gather (no per-item concat loop) ----
    src = jnp.concatenate([
        jnp.broadcast_to(sos_eos_emb[None, None, :], (B, 1, D)),
        spk[:, None, :],
        text_emb,
        pho_enc,
        jnp.broadcast_to(task_id_emb[None, None, :], (B, 1, D)),
        speech_emb,
        jnp.full((B, 1, D), float(IGNORE_ID), jnp.bfloat16),        # pad row (padding_value=IGNORE_ID)
    ], axis=1)
    S = src.shape[1]
    idx_np = np.full((B, T), S - 1, dtype=np.int32)
    for i in range(B):
        p = 0
        idx_np[i, p] = 0; p += 1                                     # sos_eos
        idx_np[i, p] = 1; p += 1                                     # speaker embedding
        for j in range(txt_len[i]):
            idx_np[i, p] = 2 + j; p += 1
        for j in range(pho_len[i]):
            idx_np[i, p] = 2 + Lt + j; p += 1
        idx_np[i, p] = 2 + Lt + Lp; p += 1                           # task_id
        for j in range(sp_len[i]):
            idx_np[i, p] = 3 + Lt + Lp + j; p += 1
        assert p == seq_lens[i]
    gather_idx = jnp.asarray(idx_np)
    lm_input = src[jnp.arange(B)[:, None], gather_idx]               # (B, T, D) bf16
    lm_input_len = jnp.asarray(seq_lens, jnp.int32)

    # ---- stand-in llm block: fused-QKV causal attention + residual + FFN (all Pallas) ----
    M = B * T
    x2 = lm_input.reshape(M, D)
    q2, k2, v2 = pallas_qkv(x2, params["wqkv"], params["bqkv"])      # three (M, D) bf16, no slices
    attn = pallas_flash_attention(q2.reshape(B, T, D), k2.reshape(B, T, D),
                                  v2.reshape(B, T, D), lm_input_len)  # (B, T, D) bf16
    lm_output = pallas_attn_block(attn.reshape(M, D), x2,
                                  params["wo"], params["bo"],
                                  params["ffn_w1"], params["ffn_b1"],
                                  params["ffn_w2"], params["ffn_b2"])  # (M, D) bf16

    # ---- llm_decoder matmul fused into LabelSmoothingLoss + th_accuracy reduction ----
    loss_sum, n_valid, n_correct = pallas_decoder_loss(
        lm_output, params["dec_w"], params["dec_b"], lm_target.reshape(M),
        smoothing=cfg["lsm_weight"])
    n_valid = jnp.maximum(n_valid, 1.0)
    denom = n_valid if cfg["length_normalized_loss"] else jnp.float32(B)
    loss = loss_sum / denom
    acc = n_correct / n_valid
    return {"loss": loss, "acc": acc}


# ---------------------------------- main ------------------------------------

if __name__ == "__main__":
    cfg = dict(
        text_encoder_input_size=128,
        llm_input_size=128,
        llm_output_size=128,
        text_token_size=40, text_token_dim=64,      # phoneme token table
        text_tone_size=8, text_tone_dim=32,
        text_lang_size=4, text_lang_dim=16,
        text_prsd_size=6, text_prsd_dim=16,
        llm_text_vocab=64,
        speech_token_size=125,                      # decoder / speech-embedding vocab = 128
        spk_embed_dim=128,
        ffn_size=256,
        lsm_weight=0.0,
        length_normalized_loss=True,
        use_frontend_prsd=False,
    )

    key = jax.random.PRNGKey(0)
    kp, k1, k2, k3, k4, k5, k6, k7 = jax.random.split(key, 8)
    params = init_params(kp, cfg)

    B, Lt, Lp, Ls = 2, 4, 6, 5
    pho_cols = [
        jax.random.randint(k2, (B, Lp, 1), 0, cfg["text_token_size"], dtype=jnp.int32),
        jax.random.randint(k3, (B, Lp, 1), 0, cfg["text_tone_size"], dtype=jnp.int32),
        jax.random.randint(k4, (B, Lp, 1), 0, cfg["text_lang_size"], dtype=jnp.int32),
        jax.random.randint(k5, (B, Lp, 1), 0, cfg["text_prsd_size"], dtype=jnp.int32),
    ]
    batch = dict(
        text_token=jax.random.randint(k1, (B, Lt), 0, cfg["llm_text_vocab"], dtype=jnp.int32),
        text_token_len=[4, 3],
        pho_token=jnp.concatenate(pho_cols, axis=-1),
        pho_token_len=[6, 5],
        speech_token=jax.random.randint(k6, (B, Ls), 0, cfg["speech_token_size"], dtype=jnp.int32),
        speech_token_len=[5, 4],
        embedding=jax.random.normal(k7, (B, cfg["spk_embed_dim"]), jnp.float32),
    )

    out = qwen2lm_phoneme_forward(params, batch, cfg)
    jax.block_until_ready(out["loss"])
    jax.block_until_ready(out["acc"])
    assert jnp.isfinite(out["loss"]) and jnp.isfinite(out["acc"])
    print("KERNEL_OK")
</pallas_src>

<mosaic_0001>
module attributes {stable_mosaic.version = 11 : i64} {
  func.func @_encoder_kernel(%arg0: i32, %arg1: memref<12x128xbf16, #tpu.memory_space<vmem>>, %arg2: memref<128x128xbf16, #tpu.memory_space<vmem>>, %arg3: memref<1x128xf32, #tpu.memory_space<vmem>>, %arg4: memref<128x128xbf16, #tpu.memory_space<vmem>>, %arg5: memref<1x128xf32, #tpu.memory_space<vmem>>, %arg6: memref<12x128xbf16, #tpu.memory_space<vmem>>) attributes {dimension_semantics = [#tpu.dimension_semantics<parallel>], iteration_bounds = array<i64: 1>, scalar_prefetch = 0 : i64, scratch_operands = 0 : i64, tpu.core_type = #tpu.core_type<tc>, window_params = [{transform_indices = @transform_0, window_bounds = array<i64: 12, 128>}, {pipeline_mode = #tpu.pipeline_mode<synchronous>, transform_indices = @transform_1, window_bounds = array<i64: 128, 128>}, {pipeline_mode = #tpu.pipeline_mode<synchronous>, transform_indices = @transform_2, window_bounds = array<i64: 1, 128>}, {pipeline_mode = #tpu.pipeline_mode<synchronous>, transform_indices = @transform_3, window_bounds = array<i64: 128, 128>}, {pipeline_mode = #tpu.pipeline_mode<synchronous>, transform_indices = @transform_4, window_bounds = array<i64: 1, 128>}, {transform_indices = @transform_5, window_bounds = array<i64: 12, 128>}]} {
    %c0 = arith.constant 0 : index
    %c0_0 = arith.constant 0 : index
    %0 = vector.load %arg1[%c0, %c0_0] : memref<12x128xbf16, #tpu.memory_space<vmem>>, vector<12x128xbf16>
    %c0_1 = arith.constant 0 : index
    %c0_2 = arith.constant 0 : index
    %1 = vector.load %arg2[%c0_1, %c0_2] : memref<128x128xbf16, #tpu.memory_space<vmem>>, vector<128x128xbf16>
    %cst = arith.constant dense<0.000000e+00> : vector<12x128xf32>
    %2 = tpu.matmul %0, %1, %cst {dimension_numbers = #tpu.dot_dimension_numbers<[1], [0], [0], [1], [0, 0, 1, 1], [], []>} : vector<12x128xbf16>, vector<128x128xbf16>, vector<12x128xf32> -> vector<12x128xf32>
    %c0_3 = arith.constant 0 : index
    %c0_4 = arith.constant 0 : index
    %3 = vector.load %arg3[%c0_3, %c0_4] : memref<1x128xf32, #tpu.memory_space<vmem>>, vector<1x128xf32>
    %4 = vector.broadcast %3 : vector<1x128xf32> to vector<12x128xf32>
    %5 = arith.addf %2, %4 : vector<12x128xf32>
    %6 = math.tanh %5 : vector<12x128xf32>
    %7 = arith.truncf %6 : vector<12x128xf32> to vector<12x128xbf16>
    %c0_5 = arith.constant 0 : index
    %c0_6 = arith.constant 0 : index
    %8 = vector.load %arg4[%c0_5, %c0_6] : memref<128x128xbf16, #tpu.memory_space<vmem>>, vector<128x128xbf16>
    %cst_7 = arith.constant dense<0.000000e+00> : vector<12x128xf32>
    %9 = tpu.matmul %7, %8, %cst_7 {dimension_numbers = #tpu.dot_dimension_numbers<[1], [0], [0], [1], [0, 0, 1, 1], [], []>} : vector<12x128xbf16>, vector<128x128xbf16>, vector<12x128xf32> -> vector<12x128xf32>
    %c0_8 = arith.constant 0 : index
    %c0_9 = arith.constant 0 : index
    %10 = vector.load %arg5[%c0_8, %c0_9] : memref<1x128xf32, #tpu.memory_space<vmem>>, vector<1x128xf32>
    %11 = vector.broadcast %10 : vector<1x128xf32> to vector<12x128xf32>
    %12 = arith.addf %9, %11 : vector<12x128xf32>
    %13 = arith.truncf %12 : vector<12x128xf32> to vector<12x128xbf16>
    %c0_10 = arith.constant 0 : index
    %c0_11 = arith.constant 0 : index
    %14 = vector.load %arg6[%c0_10, %c0_11] : memref<12x128xbf16, #tpu.memory_space<vmem>>, vector<12x128xbf16>
    tpu.vector_store %arg6[%c0_10, %c0_11], %13 {strides = array<i32>} : memref<12x128xbf16, #tpu.memory_space<vmem>>, vector<12x128xbf16>,
    return
  }
  func.func @transform_0(%arg0: i32) -> (i32, i32) {
    %c0_i32 = arith.constant 0 : i32
    %c0_i32_0 = arith.constant 0 : i32
    return %arg0, %c0_i32 : i32, i32
  }
  func.func @transform_1(%arg0: i32) -> (i32, i32) {
    %c0_i32 = arith.constant 0 : i32
    %c0_i32_0 = arith.constant 0 : i32
    %c0_i32_1 = arith.constant 0 : i32
    return %c0_i32, %c0_i32_0 : i32, i32
  }
  func.func @transform_2(%arg0: i32) -> (i32, i32) {
    %c0_i32 = arith.constant 0 : i32
    %c0_i32_0 = arith.constant 0 : i32
    %c0_i32_1 = arith.constant 0 : i32
    return %c0_i32, %c0_i32_0 : i32, i32
  }
  func.func @transform_3(%arg0: i32) -> (i32, i32) {
    %c0_i32 = arith.constant 0 : i32
    %c0_i32_0 = arith.constant 0 : i32
    %c0_i32_1 = arith.constant 0 : i32
    return %c0_i32, %c0_i32_0 : i32, i32
  }
  func.func @transform_4(%arg0: i32) -> (i32, i32) {
    %c0_i32 = arith.constant 0 : i32
    %c0_i32_0 = arith.constant 0 : i32
    %c0_i32_1 = arith.constant 0 : i32
    return %c0_i32, %c0_i32_0 : i32, i32
  }
  func.func @transform_5(%arg0: i32) -> (i32, i32) {
    %c0_i32 = arith.constant 0 : i32
    %c0_i32_0 = arith.constant 0 : i32
    return %arg0, %c0_i32 : i32, i32
  }
}

</mosaic_0001>

<bundles_post_ra>
// kernel: tpu_custom_call.1
= control target key start
LH: loop header
LB: loop body
LE: loop exit
PB: predicated region body
PF: predicated region fallthrough
CT: control target
= control target key end

     0   :  { %10 = vsyncpa [#allocation3], 0  ;;  %s532_s0 = inlined_call_operand.hbm [shape: bf16[12,128], index: 0, kind: input, shape index: {}]   ;;  %s533_s1 = inlined_call_operand.hbm [shape: bf16[128,128], index: 1, kind: input, shape index: {}]   ;;  %s534_s2 = inlined_call_operand.vmem [shape: f32[1,128], index: 2, kind: input, shape index: {}]   ;;  %s535_s3 = inlined_call_operand.hbm [shape: bf16[128,128], index: 3, kind: input, shape index: {}]   ;;  %s536_s4 = inlined_call_operand.vmem [shape: f32[1,128], index: 4, kind: input, shape index: {}]   ;;  %s537_s5 = inlined_call_operand.hbm [shape: bf16[12,128], index: 5, kind: output, shape index: {}]  }
   0x1   :  { %11 = vsyncpa [#allocation6], 0 }
   0x2   :  { %12 = vsyncpa [#allocation4], 0  ;;  %s30_s20 = sshll.u32 %s533_s1, 4  ;;  %s466_s21 = smov [#allocation5]   ;;  %s31_s20 = int_to_ptr.hbm [resolvable:$true] %s30_s20 }
   0x3   :  { %s32_s22 = sshll.u32 %s466_s21, 4  ;;  %s17_s25 = sshll.u32 %s532_s0, 4  ;;  %s33_s22 = int_to_ptr.vmem [resolvable:$true] %s32_s22  ;;  %s18_s25 = int_to_ptr.hbm [resolvable:$true] %s17_s25 }
   0x4   :  { %s467_s26 = smov 64   ;;  %s468_s27 = smov 4  }
   0x5   :  { %38 = dma.hbm_to_vmem [thread:$0]  %s31_s20, 1024, %s33_s22, [#allocation6], %s467_s26, %s467_s26, %s468_s27  }
   0x6   :  { %s469_s28 = smov [#allocation2]   ;;  %s45_s1 = sshll.u32 %s535_s3, 4  ;;  %s46_s1 = int_to_ptr.hbm [resolvable:$true] %s45_s1 }
   0x7   :  { %s19_s29 = sshll.u32 %s469_s28, 4  ;;  %s470_s0 = smov [#allocation7]   ;;  %s20_s29 = int_to_ptr.vmem [resolvable:$true] %s19_s29 }
   0x8   :  { %25 = dma.hbm_to_vmem [thread:$0]  %s18_s25, 128, %s20_s29, [#allocation3], %s467_s26, %s467_s26, %s468_s27  }
   0x9   :  { %s47_s7 = sshll.u32 %s470_s0, 4  ;;  %s48_s7 = int_to_ptr.vmem [resolvable:$true] %s47_s7 }
   0xa   :  { %53 = dma.hbm_to_vmem [thread:$0]  %s46_s1, 1024, %s48_s7, [#allocation6], %s467_s26, %s467_s26, %s468_s27  }
   0xb   :  { %460 = dma.done.wait [#allocation3], 128  }
   0xc   :  { %461 = vsyncadd [#allocation3], 4294967168 }
   0xd   :  { %462 = dma.done.wait [#allocation6], 2048  }
   0xe   :  { %463 = vsyncadd [#allocation6], 4294965248  ;;  %v343_v0 = vld [vmem:[#allocation5 + $0x38] sm:$0xff]  ;;  %v342_v1 = vld [vmem:[#allocation5 + $0x30] sm:$0xff]  ;;  %s471_s11 = smov [#allocation8]   ;;  %s253_s14 = sshll.u32 %s537_s5, 4  ;;  %s254_s14 = int_to_ptr.hbm [resolvable:$true] %s253_s14 }
   0xf   :  { %144 = vmatpush.bf16.msra.mxu0 %v343_v0  ;;  %v351_v2 = vld [vmem:[#allocation7 + $0x38] sm:$0xff]  ;;  %v350_v3 = vld [vmem:[#allocation7 + $0x30] sm:$0xff]  ;;  %v341_v4 = vld [vmem:[#allocation5 + $0x28] sm:$0xff] }
  0x10   :  { %229 = vmatpush.bf16.msra.mxu1 %v351_v2  ;;  %v349_v5 = vld [vmem:[#allocation7 + $0x28] sm:$0xff]  ;;  %v340_v6 = vld [vmem:[#allocation5 + $0x20] sm:$0xff]  ;;  %v339_v7 = vld [vmem:[#allocation5 + $0x18] sm:$0xff] }
  0x11   :  { %v338_v8 = vld [vmem:[#allocation5 + $0x10] sm:$0xff]  ;;  %v337_v9 = vld [vmem:[#allocation5 + $0x8] sm:$0xff]  ;;  %v336_v10 = vld [vmem:[#allocation5] sm:$0xff] }
  0x12   :  { %v269_v11 = vld [vmem:[#allocation2] sm:$0xf]  ;;  %v335_v12 = vld [vmem:[#allocation2] sm:$0x30]  ;;  %v348_v14 = vld [vmem:[#allocation7 + $0x20] sm:$0xff] }
  0x13   :  { %145 = vmatpush.bf16.msra.mxu0 %v342_v1  ;;  %v270_v13 = vor.u32 %v335_v12, %v269_v11  ;;  %v347_v15 = vld [vmem:[#allocation7 + $0x18] sm:$0xff]  ;;  %v346_v16 = vld [vmem:[#allocation7 + $0x10] sm:$0xff]  ;;  %v345_v17 = vld [vmem:[#allocation7 + $0x8] sm:$0xff] }
  0x14   :  { %230 = vmatpush.bf16.msra.mxu1 %v350_v3  ;;  %v344_v18 = vld [vmem:[#allocation7] sm:$0xff]  ;;  %v358_v20 = vld [vmem:[%s534_s2] ss:$0 sm:$0xff]  ;;  %s251_s2 = sshll.u32 %s471_s11, 4  ;;  %s252_s2 = int_to_ptr.vmem [resolvable:$true] %s251_s2 }
  0x15   :  { %v359_v27 = vld [vmem:[%s536_s4] ss:$0 sm:$0xff] }
  0x17   :  { %146 = vmatpush.bf16.msra.mxu0 %v341_v4 }
  0x18   :  { %231 = vmatpush.bf16.msra.mxu1 %v349_v5 }
  0x1b   :  { %147 = vmatpush.bf16.msra.mxu0 %v340_v6 }
  0x1c   :  { %232 = vmatpush.bf16.msra.mxu1 %v348_v14 }
  0x1f   :  { %148 = vmatpush.bf16.msra.mxu0 %v339_v7 }
  0x20   :  { %233 = vmatpush.bf16.msra.mxu1 %v347_v15 }
  0x23   :  { %149 = vmatpush.bf16.msra.mxu0 %v338_v8 }
  0x24   :  { %234 = vmatpush.bf16.msra.mxu1 %v346_v16 }
  0x27   :  { %150 = vmatpush.bf16.msra.mxu0 %v337_v9 }
  0x28   :  { %235 = vmatpush.bf16.msra.mxu1 %v345_v17 }
  0x2b   :  { %151 = vmatpush.bf16.msra.mxu0 %v336_v10 }
  0x2c   :  { %236 = vmatpush.bf16.msra.mxu1 %v344_v18 }
  0x2e   :  { %152 = vmatmul.bf16.vlgmr.msra.gmra.mxu0 %v270_v13 }
  0xab   :  { %v153_v19 = vpop.f32.mrf.mxu0 }
  0xac   :  { %v154_v21 = vadd.f32 %v358_v20, %v153_v19 }
  0xae   :  { %360 = vtanh.f32 %v154_v21 }
  0xb3   :  { %v155_v22 = vpop.f32.mrf.mxu0 }
  0xb4   :  { %v156_v23 = vadd.f32 %v358_v20, %v155_v22  ;;  %v361_v24 = vpop.eup %360 }
  0xb6   :  { %362 = vtanh.f32 %v156_v23 }
  0xbc   :  { %v363_v25 = vpop.eup %362 }
  0xbd   :  { %v160_v26 = vpack.c.bf16 %v363_v25, %v361_v24 }
  0xbf   :  { %237 = vmatmul.bf16.vlgmr.msra.gmra.mxu1 %v160_v26 }
 0x13c   :  { %v238_v28 = vpop.f32.mrf.mxu1 }
 0x13d   :  { %v239_v29 = vadd.f32 %v359_v27, %v238_v28 }
 0x13f   :  { %v243_v30 = vpack.c.bf16 %v239_v29, %v239_v29 }
 0x141   :  { %245 = vst [vmem:[#allocation8] sm:$0xf] %v243_v30 }
 0x144   :  { %v240_v31 = vpop.f32.mrf.mxu1 }
 0x145   :  { %v241_v32 = vadd.f32 %v359_v27, %v240_v31 }
 0x147   :  { %v244_v33 = vpack.c.bf16 %v241_v32, %v241_v32 }
 0x149   :  { %246 = vst [vmem:[#allocation8 + $0x4] sm:$0x3] %v244_v33 }
 0x14a   :  { %259 = dma.vmem_to_hbm [thread:$0]  %s252_s2, 128, %s254_s14, [#allocation4], %s467_s26, %s467_s26, %s468_s27  }
 0x14b   :  { %464 = dma.done.wait [#allocation4], 128  }
 0x14c   :  { %465 = vsyncadd [#allocation4], 4294967168 }
 0x14d   :  { %264 = vsyncpa [#allocation3], 1 }
 0x14e   :  { %265 = vsyncpa [#allocation6], 1 }
 0x14f   :  { %266 = vsyncpa [#allocation4], 1 }

</bundles_post_ra>
